<compile_context>
chip_gen: v7x
topology: tpu7x:2x2x1
jax: 0.10.0
libtpu: 0.0.40
codegen_flags: <defaults>
</compile_context>

<pallas_src>
import jax
import jax.numpy as jnp
from jax.experimental import pallas as pl
from jax.experimental.pallas import tpu as pltpu

_LANE = 128
_SUBLANE = 8


def _round_up(x, m):
    return ((x + m - 1) // m) * m


def _vmem_capacity_bytes():
    try:
        return int(pltpu.get_tpu_info().vmem_capacity_bytes)
    except Exception:
        return 64 * 2 ** 20          # conservative default (v7x per-TC VMEM)


def _largest_div8_divisor(b, upper):
    """Largest t <= upper with t % 8 == 0 and b % t == 0, else None."""
    t = min(upper, b)
    t -= t % _SUBLANE
    while t >= _SUBLANE:
        if b % t == 0:
            return t
        t -= _SUBLANE
    return None


def _choose_batch_tile(batch, block_b):
    """Pick (TB, Bp): TB % 8 == 0, TB divides Bp, Bp == batch when batch is
    8-aligned (no wrapper pad). Prefer >=2 grid steps (v7x megacore)."""
    if batch % _SUBLANE == 0:
        tb = (_largest_div8_divisor(batch, block_b)
              or _largest_div8_divisor(batch, batch))
        if batch // tb < 2:                      # try to give both TCs work
            half = _largest_div8_divisor(batch, batch // 2)
            if half is not None:
                tb = half
        return tb, batch
    # batch not sublane-aligned: pad (costs one extra pass over features)
    tb = min(_round_up(block_b, _SUBLANE), _round_up(batch, _SUBLANE))
    return tb, _round_up(batch, tb)


def _pick_class_tile(c_pad, fits):
    """Widest lane-dense class tile dividing c_pad that fits the VMEM budget."""
    m = c_pad // _LANE
    for d in sorted((d for d in range(1, m + 1) if m % d == 0), reverse=True):
        tc = _LANE * d
        if fits(tc, c_pad // tc):
            return tc
    return _LANE


def _head_kernel(x_ref, w1_ref, b1_ref, w2_ref, b2_ref, out_ref, h_ref):
    # grid = (batch_tiles, class_tiles); class axis iterates innermost, so the
    # hidden activation is computed once per batch tile and reused for every
    # class tile via the VMEM scratch h_ref.
    @pl.when(pl.program_id(1) == 0)
    def _():
        # cast to the weight dtype -> guaranteed bf16 MXU operands when the
        # params were prepped in bf16 (f32 features stay f32 otherwise)
        x = x_ref[...].astype(w1_ref.dtype)
        h = jnp.dot(x, w1_ref[...], preferred_element_type=jnp.float32)
        h_ref[...] = jnp.tanh(h + b1_ref[...])          # bias + tanh in f32

    y = jnp.dot(h_ref[...].astype(w2_ref.dtype), w2_ref[...],
                preferred_element_type=jnp.float32)
    out_ref[...] = (y + b2_ref[...]).astype(out_ref.dtype)


def prepare_head_params(w_dense, b_dense, w_out, b_out, *, dtype=None):
    """One-time parameter prep (load time, NOT per forward call):
      * transpose torch [out, in] weights to MXU-native [K, N] layouts
      * zero-pad D_in / D_hid / num_classes up to lane-dense multiples of 128
        (classes additionally to 256 when large, for the 256-wide MXU)
      * optionally cast matmul weights to `dtype` (e.g. jnp.bfloat16)."""
    d_hid, d_in = w_dense.shape
    c = w_out.shape[0]
    d_in_p = _round_up(d_in, _LANE)
    d_hid_p = _round_up(d_hid, _LANE)
    c_pad = _round_up(max(c, _LANE), _LANE)
    if c_pad > _LANE:                      # big second matmul: 256-wide MXU
        c_pad = _round_up(c_pad, 2 * _LANE)

    wdt = dtype if dtype is not None else w_dense.dtype
    w1 = jnp.zeros((d_in_p, d_hid_p), wdt).at[:d_in, :d_hid].set(
        w_dense.T.astype(wdt))
    w2 = jnp.zeros((d_hid_p, c_pad), wdt).at[:d_hid, :c].set(
        w_out.T.astype(wdt))
    b1 = jnp.zeros((1, d_hid_p), jnp.float32).at[0, :d_hid].set(
        b_dense.astype(jnp.float32))
    b2 = jnp.zeros((1, c_pad), jnp.float32).at[0, :c].set(
        b_out.astype(jnp.float32))
    return dict(w1=w1, b1=b1, w2=w2, b2=b2, num_classes=c)


def classification_head(features, params, *, block_b=1024):
    """ClassificationHead.forward (mode='tgt', eval). features: [B, input_dim].
    Returns f32 logits [B, num_classes]."""
    w1, b1, w2, b2 = params["w1"], params["b1"], params["w2"], params["b2"]
    num_classes = params["num_classes"]
    batch = features.shape[0]
    d_in_p, d_hid_p = w1.shape
    c_pad = w2.shape[1]

    tb, bp = _choose_batch_tile(batch, block_b)
    if features.shape[1] != d_in_p:                      # lane-dense input
        features = jnp.pad(features, ((0, 0), (0, d_in_p - features.shape[1])))
    if bp != batch:                                      # sublane-align batch
        features = jnp.pad(features, ((0, bp - batch), (0, 0)))

    x_isz = jnp.dtype(features.dtype).itemsize
    w_isz = jnp.dtype(w1.dtype).itemsize
    out_isz = 4                                          # f32 logits

    vmem_cap = _vmem_capacity_bytes()
    budget = int(0.85 * vmem_cap)                        # headroom for Mosaic

    def need_bytes(tc, n_c, single_buffer_residents):
        w1_bufs = 1 if single_buffer_residents else 2
        w2_bufs = 1 if (n_c == 1 and single_buffer_residents) else 2
        res = (d_in_p * d_hid_p * w_isz + d_hid_p * 4) * w1_bufs
        res += (d_hid_p * tc * w_isz + tc * 4) * w2_bufs
        streamed = 2 * tb * d_in_p * x_isz + 2 * tb * tc * out_isz
        scratch = tb * d_hid_p * 4
        return res + streamed + scratch

    # keep W2 fully resident when it fits; otherwise stream class tiles
    tc = _pick_class_tile(c_pad, lambda t, n: need_bytes(t, n, True) <= budget)
    n_c = c_pad // tc

    def build(single_buffer_residents):
        res_kw = ({"pipeline_mode": pl.Buffered(1)}
                  if single_buffer_residents else {})
        w2_kw = res_kw if n_c == 1 else {}
        need = need_bytes(tc, n_c, single_buffer_residents)
        vmem_limit = int(min(max(need + (2 << 20), 16 << 20), vmem_cap))
        cost = pl.CostEstimate(
            flops=2 * bp * (d_in_p * d_hid_p + d_hid_p * c_pad),
            transcendentals=bp * d_hid_p,
            bytes_accessed=(bp * d_in_p * x_isz + bp * c_pad * out_isz
                            + (d_in_p * d_hid_p + d_hid_p * c_pad) * w_isz
                            + (d_hid_p + c_pad) * 4),
        )
        grid_spec = pltpu.PrefetchScalarGridSpec(
            num_scalar_prefetch=0,
            grid=(bp // tb, n_c),
            in_specs=[
                pl.BlockSpec((tb, d_in_p), lambda i, j: (i, 0)),       # stream
                pl.BlockSpec((d_in_p, d_hid_p), lambda i, j: (0, 0), **res_kw),
                pl.BlockSpec((1, d_hid_p), lambda i, j: (0, 0), **res_kw),
                pl.BlockSpec((d_hid_p, tc), lambda i, j: (0, j), **w2_kw),
                pl.BlockSpec((1, tc), lambda i, j: (0, j), **w2_kw),
            ],
            out_specs=pl.BlockSpec((tb, tc), lambda i, j: (i, j)),
            scratch_shapes=[pltpu.VMEM((tb, d_hid_p), jnp.float32)],
        )
        return pl.pallas_call(
            _head_kernel,
            out_shape=jax.ShapeDtypeStruct((bp, c_pad), jnp.float32),
            grid_spec=grid_spec,
            compiler_params=pltpu.CompilerParams(
                dimension_semantics=("parallel", "arbitrary"),
                vmem_limit_bytes=vmem_limit,
            ),
            cost_estimate=cost,
        )

    try:
        out_padded = build(True)(features, w1, b1, w2, b2)
    except Exception:
        # pl.Buffered(1) not accepted by this jax build: fall back to the
        # default double-buffered resident operands (correctness identical).
        out_padded = build(False)(features, w1, b1, w2, b2)

    # slice off batch padding and lane padding of num_classes
    return out_padded[:batch, :num_classes]


if __name__ == "__main__":
    key = jax.random.PRNGKey(0)
    B, input_dim, inner_dim, num_classes = 8, 32, 32, 4

    k_x, k_w1, k_b1, k_w2, k_b2 = jax.random.split(key, 5)

    # deterministic nn.Linear-style init: U(-1/sqrt(fan_in), 1/sqrt(fan_in))
    lim1 = 1.0 / (input_dim ** 0.5)
    lim2 = 1.0 / (inner_dim ** 0.5)
    features = jax.random.normal(k_x, (B, input_dim), dtype=jnp.float32)
    w_dense = jax.random.uniform(k_w1, (inner_dim, input_dim),
                                 minval=-lim1, maxval=lim1, dtype=jnp.float32)
    b_dense = jax.random.uniform(k_b1, (inner_dim,),
                                 minval=-lim1, maxval=lim1, dtype=jnp.float32)
    w_out = jax.random.uniform(k_w2, (num_classes, inner_dim),
                               minval=-lim2, maxval=lim2, dtype=jnp.float32)
    b_out = jax.random.uniform(k_b2, (num_classes,),
                               minval=-lim2, maxval=lim2, dtype=jnp.float32)

    # one-time parameter prep (transpose / pad / dtype), outside the hot path
    params = prepare_head_params(w_dense, b_dense, w_out, b_out)

    pred = classification_head(features, params)
    pred = jax.block_until_ready(pred)

    # pure-JAX reference check
    ref = jnp.tanh(features @ w_dense.T + b_dense) @ w_out.T + b_out
    assert pred.shape == (B, num_classes)
    assert jnp.allclose(pred, ref, atol=1e-5, rtol=1e-5)

    print("KERNEL_OK")
</pallas_src>

<mosaic_0001>
module attributes {stable_mosaic.version = 11 : i64} {
  func.func @_head_kernel(%arg0: i32, %arg1: i32, %arg2: memref<8x128xf32, #tpu.memory_space<vmem>>, %arg3: memref<128x128xf32, #tpu.memory_space<vmem>>, %arg4: memref<1x128xf32, #tpu.memory_space<vmem>>, %arg5: memref<128x128xf32, #tpu.memory_space<vmem>>, %arg6: memref<1x128xf32, #tpu.memory_space<vmem>>, %arg7: memref<8x128xf32, #tpu.memory_space<vmem>>, %arg8: memref<8x128xf32, #tpu.memory_space<vmem>>) attributes {dimension_semantics = [#tpu.dimension_semantics<parallel>, #tpu.dimension_semantics<arbitrary>], iteration_bounds = array<i64: 1, 1>, scalar_prefetch = 0 : i64, scratch_operands = 1 : i64, tpu.core_type = #tpu.core_type<tc>, window_params = [{transform_indices = @transform_0, window_bounds = array<i64: 8, 128>}, {pipeline_mode = #tpu.pipeline_mode<synchronous>, transform_indices = @transform_1, window_bounds = array<i64: 128, 128>}, {pipeline_mode = #tpu.pipeline_mode<synchronous>, transform_indices = @transform_2, window_bounds = array<i64: 1, 128>}, {pipeline_mode = #tpu.pipeline_mode<synchronous>, transform_indices = @transform_3, window_bounds = array<i64: 128, 128>}, {pipeline_mode = #tpu.pipeline_mode<synchronous>, transform_indices = @transform_4, window_bounds = array<i64: 1, 128>}, {transform_indices = @transform_5, window_bounds = array<i64: 8, 128>}]} {
    %c0_i32 = arith.constant 0 : i32
    %0 = arith.cmpi eq, %arg1, %c0_i32 : i32
    %1 = arith.extui %0 : i1 to i32
    %c0_i32_0 = arith.constant 0 : i32
    %2 = arith.cmpi ne, %1, %c0_i32_0 : i32
    scf.if %2 {
      %c0_8 = arith.constant 0 : index
      %c0_9 = arith.constant 0 : index
      %10 = vector.load %arg2[%c0_8, %c0_9] : memref<8x128xf32, #tpu.memory_space<vmem>>, vector<8x128xf32>
      %c0_10 = arith.constant 0 : index
      %c0_11 = arith.constant 0 : index
      %11 = vector.load %arg3[%c0_10, %c0_11] : memref<128x128xf32, #tpu.memory_space<vmem>>, vector<128x128xf32>
      %cst_12 = arith.constant dense<0.000000e+00> : vector<8x128xf32>
      %12 = tpu.matmul %10, %11, %cst_12 {dimension_numbers = #tpu.dot_dimension_numbers<[1], [0], [0], [1], [0, 0, 1, 1], [], []>} : vector<8x128xf32>, vector<128x128xf32>, vector<8x128xf32> -> vector<8x128xf32>
      %c0_13 = arith.constant 0 : index
      %c0_14 = arith.constant 0 : index
      %13 = vector.load %arg4[%c0_13, %c0_14] : memref<1x128xf32, #tpu.memory_space<vmem>>, vector<1x128xf32>
      %14 = vector.broadcast %13 : vector<1x128xf32> to vector<8x128xf32>
      %15 = arith.addf %12, %14 : vector<8x128xf32>
      %16 = math.tanh %15 : vector<8x128xf32>
      %c0_15 = arith.constant 0 : index
      %c0_16 = arith.constant 0 : index
      %17 = vector.load %arg8[%c0_15, %c0_16] : memref<8x128xf32, #tpu.memory_space<vmem>>, vector<8x128xf32>
      tpu.vector_store %arg8[%c0_15, %c0_16], %16 {strides = array<i32>} : memref<8x128xf32, #tpu.memory_space<vmem>>, vector<8x128xf32>,
    } else {
    }
    %c0 = arith.constant 0 : index
    %c0_1 = arith.constant 0 : index
    %3 = vector.load %arg8[%c0, %c0_1] : memref<8x128xf32, #tpu.memory_space<vmem>>, vector<8x128xf32>
    %c0_2 = arith.constant 0 : index
    %c0_3 = arith.constant 0 : index
    %4 = vector.load %arg5[%c0_2, %c0_3] : memref<128x128xf32, #tpu.memory_space<vmem>>, vector<128x128xf32>
    %cst = arith.constant dense<0.000000e+00> : vector<8x128xf32>
    %5 = tpu.matmul %3, %4, %cst {dimension_numbers = #tpu.dot_dimension_numbers<[1], [0], [0], [1], [0, 0, 1, 1], [], []>} : vector<8x128xf32>, vector<128x128xf32>, vector<8x128xf32> -> vector<8x128xf32>
    %c0_4 = arith.constant 0 : index
    %c0_5 = arith.constant 0 : index
    %6 = vector.load %arg6[%c0_4, %c0_5] : memref<1x128xf32, #tpu.memory_space<vmem>>, vector<1x128xf32>
    %7 = vector.broadcast %6 : vector<1x128xf32> to vector<8x128xf32>
    %8 = arith.addf %5, %7 : vector<8x128xf32>
    %c0_6 = arith.constant 0 : index
    %c0_7 = arith.constant 0 : index
    %9 = vector.load %arg7[%c0_6, %c0_7] : memref<8x128xf32, #tpu.memory_space<vmem>>, vector<8x128xf32>
    tpu.vector_store %arg7[%c0_6, %c0_7], %8 {strides = array<i32>} : memref<8x128xf32, #tpu.memory_space<vmem>>, vector<8x128xf32>,
    return
  }
  func.func @transform_0(%arg0: i32, %arg1: i32) -> (i32, i32) {
    %c0_i32 = arith.constant 0 : i32
    %c0_i32_0 = arith.constant 0 : i32
    return %arg0, %c0_i32 : i32, i32
  }
  func.func @transform_1(%arg0: i32, %arg1: i32) -> (i32, i32) {
    %c0_i32 = arith.constant 0 : i32
    %c0_i32_0 = arith.constant 0 : i32
    %c0_i32_1 = arith.constant 0 : i32
    return %c0_i32, %c0_i32_0 : i32, i32
  }
  func.func @transform_2(%arg0: i32, %arg1: i32) -> (i32, i32) {
    %c0_i32 = arith.constant 0 : i32
    %c0_i32_0 = arith.constant 0 : i32
    %c0_i32_1 = arith.constant 0 : i32
    return %c0_i32, %c0_i32_0 : i32, i32
  }
  func.func @transform_3(%arg0: i32, %arg1: i32) -> (i32, i32) {
    %c0_i32 = arith.constant 0 : i32
    %c0_i32_0 = arith.constant 0 : i32
    return %c0_i32, %arg1 : i32, i32
  }
  func.func @transform_4(%arg0: i32, %arg1: i32) -> (i32, i32) {
    %c0_i32 = arith.constant 0 : i32
    %c0_i32_0 = arith.constant 0 : i32
    return %c0_i32, %arg1 : i32, i32
  }
  func.func @transform_5(%arg0: i32, %arg1: i32) -> (i32, i32) {
    %c0_i32 = arith.constant 0 : i32
    return %arg0, %arg1 : i32, i32
  }
}

module attributes {stable_mosaic.version = 11 : i64} {
  func.func @_head_kernel(%arg0: i32, %arg1: i32, %arg2: memref<8x128xf32, #tpu.memory_space<vmem>>, %arg3: memref<128x128xf32, #tpu.memory_space<vmem>>, %arg4: memref<1x128xf32, #tpu.memory_space<vmem>>, %arg5: memref<128x128xf32, #tpu.memory_space<vmem>>, %arg6: memref<1x128xf32, #tpu.memory_space<vmem>>, %arg7: memref<8x128xf32, #tpu.memory_space<vmem>>, %arg8: memref<8x128xf32, #tpu.memory_space<vmem>>) attributes {dimension_semantics = [#tpu.dimension_semantics<parallel>, #tpu.dimension_semantics<arbitrary>], iteration_bounds = array<i64: 1, 1>, scalar_prefetch = 0 : i64, scratch_operands = 1 : i64, tpu.core_type = #tpu.core_type<tc>, window_params = [{transform_indices = @transform_0, window_bounds = array<i64: 8, 128>}, {pipeline_mode = #tpu.pipeline_mode<synchronous>, transform_indices = @transform_1, window_bounds = array<i64: 128, 128>}, {pipeline_mode = #tpu.pipeline_mode<synchronous>, transform_indices = @transform_2, window_bounds = array<i64: 1, 128>}, {transform_indices = @transform_3, window_bounds = array<i64: 128, 128>}, {transform_indices = @transform_4, window_bounds = array<i64: 1, 128>}, {transform_indices = @transform_5, window_bounds = array<i64: 8, 128>}]} {
    %c0_i32 = arith.constant 0 : i32
    %0 = arith.cmpi eq, %arg1, %c0_i32 : i32
    %1 = arith.extui %0 : i1 to i32
    %c0_i32_0 = arith.constant 0 : i32
    %2 = arith.cmpi ne, %1, %c0_i32_0 : i32
    scf.if %2 {
      %c0_8 = arith.constant 0 : index
      %c0_9 = arith.constant 0 : index
      %10 = vector.load %arg2[%c0_8, %c0_9] : memref<8x128xf32, #tpu.memory_space<vmem>>, vector<8x128xf32>
      %c0_10 = arith.constant 0 : index
      %c0_11 = arith.constant 0 : index
      %11 = vector.load %arg3[%c0_10, %c0_11] : memref<128x128xf32, #tpu.memory_space<vmem>>, vector<128x128xf32>
      %cst_12 = arith.constant dense<0.000000e+00> : vector<8x128xf32>
      %12 = tpu.matmul %10, %11, %cst_12 {dimension_numbers = #tpu.dot_dimension_numbers<[1], [0], [0], [1], [0, 0, 1, 1], [], []>} : vector<8x128xf32>, vector<128x128xf32>, vector<8x128xf32> -> vector<8x128xf32>
      %c0_13 = arith.constant 0 : index
      %c0_14 = arith.constant 0 : index
      %13 = vector.load %arg4[%c0_13, %c0_14] : memref<1x128xf32, #tpu.memory_space<vmem>>, vector<1x128xf32>
      %14 = vector.broadcast %13 : vector<1x128xf32> to vector<8x128xf32>
      %15 = arith.addf %12, %14 : vector<8x128xf32>
      %16 = math.tanh %15 : vector<8x128xf32>
      %c0_15 = arith.constant 0 : index
      %c0_16 = arith.constant 0 : index
      %17 = vector.load %arg8[%c0_15, %c0_16] : memref<8x128xf32, #tpu.memory_space<vmem>>, vector<8x128xf32>
      tpu.vector_store %arg8[%c0_15, %c0_16], %16 {strides = array<i32>} : memref<8x128xf32, #tpu.memory_space<vmem>>, vector<8x128xf32>,
    } else {
    }
    %c0 = arith.constant 0 : index
    %c0_1 = arith.constant 0 : index
    %3 = vector.load %arg8[%c0, %c0_1] : memref<8x128xf32, #tpu.memory_space<vmem>>, vector<8x128xf32>
    %c0_2 = arith.constant 0 : index
    %c0_3 = arith.constant 0 : index
    %4 = vector.load %arg5[%c0_2, %c0_3] : memref<128x128xf32, #tpu.memory_space<vmem>>, vector<128x128xf32>
    %cst = arith.constant dense<0.000000e+00> : vector<8x128xf32>
    %5 = tpu.matmul %3, %4, %cst {dimension_numbers = #tpu.dot_dimension_numbers<[1], [0], [0], [1], [0, 0, 1, 1], [], []>} : vector<8x128xf32>, vector<128x128xf32>, vector<8x128xf32> -> vector<8x128xf32>
    %c0_4 = arith.constant 0 : index
    %c0_5 = arith.constant 0 : index
    %6 = vector.load %arg6[%c0_4, %c0_5] : memref<1x128xf32, #tpu.memory_space<vmem>>, vector<1x128xf32>
    %7 = vector.broadcast %6 : vector<1x128xf32> to vector<8x128xf32>
    %8 = arith.addf %5, %7 : vector<8x128xf32>
    %c0_6 = arith.constant 0 : index
    %c0_7 = arith.constant 0 : index
    %9 = vector.load %arg7[%c0_6, %c0_7] : memref<8x128xf32, #tpu.memory_space<vmem>>, vector<8x128xf32>
    tpu.vector_store %arg7[%c0_6, %c0_7], %8 {strides = array<i32>} : memref<8x128xf32, #tpu.memory_space<vmem>>, vector<8x128xf32>,
    return
  }
  func.func @transform_0(%arg0: i32, %arg1: i32) -> (i32, i32) {
    %c0_i32 = arith.constant 0 : i32
    %c0_i32_0 = arith.constant 0 : i32
    return %arg0, %c0_i32 : i32, i32
  }
  func.func @transform_1(%arg0: i32, %arg1: i32) -> (i32, i32) {
    %c0_i32 = arith.constant 0 : i32
    %c0_i32_0 = arith.constant 0 : i32
    %c0_i32_1 = arith.constant 0 : i32
    return %c0_i32, %c0_i32_0 : i32, i32
  }
  func.func @transform_2(%arg0: i32, %arg1: i32) -> (i32, i32) {
    %c0_i32 = arith.constant 0 : i32
    %c0_i32_0 = arith.constant 0 : i32
    %c0_i32_1 = arith.constant 0 : i32
    return %c0_i32, %c0_i32_0 : i32, i32
  }
  func.func @transform_3(%arg0: i32, %arg1: i32) -> (i32, i32) {
    %c0_i32 = arith.constant 0 : i32
    %c0_i32_0 = arith.constant 0 : i32
    return %c0_i32, %arg1 : i32, i32
  }
  func.func @transform_4(%arg0: i32, %arg1: i32) -> (i32, i32) {
    %c0_i32 = arith.constant 0 : i32
    %c0_i32_0 = arith.constant 0 : i32
    return %c0_i32, %arg1 : i32, i32
  }
  func.func @transform_5(%arg0: i32, %arg1: i32) -> (i32, i32) {
    %c0_i32 = arith.constant 0 : i32
    return %arg0, %arg1 : i32, i32
  }
}

</mosaic_0001>

<bundles_post_ra>
// kernel: tpu_custom_call.1
= control target key start
LH: loop header
LB: loop body
LE: loop exit
PB: predicated region body
PF: predicated region fallthrough
CT: control target
= control target key end

     0   :  { %10 = vsyncpa [#allocation4], 0  ;;  %s645_s0 = inlined_call_operand.hbm [shape: f32[8,128], index: 0, kind: input, shape index: {}]   ;;  %s646_s1 = inlined_call_operand.hbm [shape: f32[128,128], index: 1, kind: input, shape index: {}]   ;;  %s647_s2 = inlined_call_operand.vmem [shape: f32[1,128], index: 2, kind: input, shape index: {}]   ;;  %s648_s3 = inlined_call_operand.hbm [shape: f32[128,128], index: 3, kind: input, shape index: {}]   ;;  %s649_s4 = inlined_call_operand.vmem [shape: f32[1,128], index: 4, kind: input, shape index: {}]   ;;  %s650_s5 = inlined_call_operand.hbm [shape: f32[8,128], index: 5, kind: output, shape index: {}]  }
   0x1   :  { %11 = vsyncpa [#allocation7], 0 }
   0x2   :  { %12 = vsyncpa [#allocation5], 0  ;;  %s530_s18 = smov [#allocation6]   ;;  %s436_s22 = scalar_lea.hbm %s646_s1, 2048 }
   0x3   :  { %s28_s19 = sshll.u32 %s530_s18, 4  ;;  %p437_p0 = scmp.ne.s32.totalorder %s646_s1, %s436_s22  ;;  %s29_s19 = int_to_ptr.vmem [resolvable:$true] %s28_s19 }
   0x4   :  { %p440_p1 = scmp.lt.u32.totalorder %s436_s22, %s646_s1 }
   0x6   :  { %p442_p2 = pnand %p440_p1, %p437_p0 }
   0x8   :  { %445 = shalt.err (!%p442_p2)
}
   0x9   :  { %s446_s27 = scalar_lea.vmem %s29_s19, 2048  ;;  %p451_p4 = scmp.lt.s32.totalorder %s29_s19, %s29_s19 }
   0xa   :  { %p447_p3 = scmp.ne.s32.totalorder %s29_s19, %s446_s27  ;;  %p452_p5 = scmp.lt.s32.totalorder %s446_s27, %s446_s27 }
   0xc   :  { %p453_p6 = por %p452_p5, %p451_p4 }
   0xe   :  { %p454_p7 = pnand %p453_p6, %p447_p3 }
  0x10   :  { %457 = shalt.err (!%p454_p7)
}
  0x11   :  { %s531_s28 = smov 128   ;;  %s532_s29 = smov 8  }
  0x12   :  { %34 = dma.hbm_to_vmem [thread:$0]  %s646_s1, 2048, %s29_s19, [#allocation7], %s531_s28, %s531_s28, %s532_s29  }
  0x13   :  { %s533_s7 = smov [#allocation3]   ;;  %s534_s9 = smov [#allocation8]  }
  0x14   :  { %s19_s8 = sshll.u32 %s533_s7, 4  ;;  %s42_s10 = sshll.u32 %s534_s9, 4  ;;  %s20_s8 = int_to_ptr.vmem [resolvable:$true] %s19_s8  ;;  %s43_s10 = int_to_ptr.vmem [resolvable:$true] %s42_s10 }
  0x15   :  { %s458_s13 = scalar_lea.hbm %s645_s0, 128 }
  0x16   :  { %p459_p8 = scmp.ne.s32.totalorder %s645_s0, %s458_s13  ;;  %p462_p9 = scmp.lt.u32.totalorder %s458_s13, %s645_s0 }
  0x18   :  { %p464_p10 = pnand %p462_p9, %p459_p8 }
  0x1a   :  { %467 = shalt.err (!%p464_p10)
}
  0x1b   :  { %s468_s1 = scalar_lea.vmem %s20_s8, 128  ;;  %p473_p12 = scmp.lt.s32.totalorder %s20_s8, %s20_s8 }
  0x1c   :  { %p469_p11 = scmp.ne.s32.totalorder %s20_s8, %s468_s1  ;;  %p474_p13 = scmp.lt.s32.totalorder %s468_s1, %s468_s1 }
  0x1e   :  { %p475_p0 = por %p474_p13, %p473_p12 }
  0x20   :  { %p476_p1 = pnand %p475_p0, %p469_p11 }
  0x22   :  { %479 = shalt.err (!%p476_p1)
}
  0x23   :  { %22 = dma.hbm_to_vmem [thread:$0]  %s645_s0, 128, %s20_s8, [#allocation4]  }
  0x24   :  { %s480_s22 = scalar_lea.hbm %s648_s3, 2048 }
  0x25   :  { %p481_p2 = scmp.ne.s32.totalorder %s648_s3, %s480_s22  ;;  %p484_p3 = scmp.lt.u32.totalorder %s480_s22, %s648_s3 }
  0x27   :  { %p486_p4 = pnand %p484_p3, %p481_p2 }
  0x29   :  { %489 = shalt.err (!%p486_p4)
}
  0x2a   :  { %s490_s27 = scalar_lea.vmem %s43_s10, 2048  ;;  %p495_p6 = scmp.lt.s32.totalorder %s43_s10, %s43_s10 }
  0x2b   :  { %p491_p5 = scmp.ne.s32.totalorder %s43_s10, %s490_s27  ;;  %p496_p7 = scmp.lt.s32.totalorder %s490_s27, %s490_s27 }
  0x2d   :  { %p497_p8 = por %p496_p7, %p495_p6 }
  0x2f   :  { %p498_p9 = pnand %p497_p8, %p491_p5 }
  0x31   :  { %501 = shalt.err (!%p498_p9)
}
  0x32   :  { %48 = dma.hbm_to_vmem [thread:$0]  %s648_s3, 2048, %s43_s10, [#allocation7], %s531_s28, %s531_s28, %s532_s29  }
  0x33   :  { %524 = dma.done.wait [#allocation4], 128  }
  0x34   :  { %525 = vsyncadd [#allocation4], 4294967168 }
  0x35   :  { %526 = dma.done.wait [#allocation7], 4096  }
  0x36   :  { %527 = vsyncadd [#allocation7], 4294963200  ;;  %v535_v0 = vmov 0.0|0.0   ;;  %vm536_vm0 = vmmov 0   ;;  %v537_v1 = vmov 0.0   ;;  %v65_v2 = vld [vmem:[#allocation6] sm:$0xff] }
  0x37   :  { %377 = vmatprep.subr.bf16.mxu0 %v535_v0  ;;  %339 = vmatprep.mubr.msk.f32.mxu0 %vm536_vm0, %v537_v1  ;;  %v66_v3 = vld [vmem:[#allocation6 + $0x8] sm:$0xff]  ;;  %v67_v4 = vld [vmem:[#allocation6 + $0x10] sm:$0xff]  ;;  %v68_v6 = vld [vmem:[#allocation6 + $0x18] sm:$0xff]  ;;  %s538_s7 = smov [#allocation9]  }
  0x38   :  { %401 = vmatprep.subr.bf16.mxu1 %v535_v0  ;;  %374 = vmatprep.mubr.msk.f32.mxu1 %vm536_vm0, %v537_v1  ;;  %v378_v5 = vpack.c.bf16 %v66_v3, %v65_v2  ;;  %v381_v7 = vpack.c.bf16 %v68_v6, %v67_v4  ;;  %v69_v8 = vld [vmem:[#allocation6 + $0x20] sm:$0xff]  ;;  %v70_v9 = vld [vmem:[#allocation6 + $0x28] sm:$0xff]  ;;  %v163_v12 = vld [vmem:[#allocation8 + $0x10] sm:$0xff]  ;;  %s261_s8 = sshll.u32 %s538_s7, 4  ;;  %s262_s8 = int_to_ptr.vmem [resolvable:$true] %s261_s8 }
  0x39   :  { %v161_v10 = vld [vmem:[#allocation8] sm:$0xff]  ;;  %v162_v11 = vld [vmem:[#allocation8 + $0x8] sm:$0xff]  ;;  %v164_v13 = vld [vmem:[#allocation8 + $0x18] sm:$0xff]  ;;  %v384_v14 = vpack.c.bf16 %v70_v9, %v69_v8  ;;  %s502_s9 = scalar_lea.vmem %s262_s8, 128  ;;  %p507_p11 = scmp.lt.s32.totalorder %s262_s8, %s262_s8 }
  0x3a   :  { %379 = vmatpush3.bf16.msra.mxu0 %v378_v5  ;;  %v402_v15 = vpack.c.bf16 %v162_v11, %v161_v10  ;;  %v71_v16 = vld [vmem:[#allocation6 + $0x30] sm:$0xff]  ;;  %v72_v17 = vld [vmem:[#allocation6 + $0x38] sm:$0xff]  ;;  %v405_v18 = vpack.c.bf16 %v164_v13, %v163_v12  ;;  %v165_v19 = vld [vmem:[#allocation8 + $0x20] sm:$0xff]  ;;  %p503_p10 = scmp.ne.s32.totalorder %s262_s8, %s502_s9  ;;  %p508_p12 = scmp.lt.s32.totalorder %s502_s9, %s502_s9 }
  0x3b   :  { %380 = vmatprep.subr.bf16.mxu0 %v535_v0  ;;  %v166_v20 = vld [vmem:[#allocation8 + $0x28] sm:$0xff]  ;;  %v387_v21 = vpack.c.bf16 %v72_v17, %v71_v16  ;;  %v73_v22 = vld [vmem:[#allocation6 + $0x40] sm:$0xff]  ;;  %v167_v25 = vld [vmem:[#allocation8 + $0x30] sm:$0xff] }
  0x3c   :  { %403 = vmatpush3.bf16.msra.mxu1 %v402_v15  ;;  %v74_v23 = vld [vmem:[#allocation6 + $0x48] sm:$0xff]  ;;  %v408_v24 = vpack.c.bf16 %v166_v20, %v165_v19  ;;  %v168_v26 = vld [vmem:[#allocation8 + $0x38] sm:$0xff]  ;;  %v75_v28 = vld [vmem:[#allocation6 + $0x50] sm:$0xff]  ;;  %p509_p13 = por %p508_p12, %p507_p11 }
  0x3d   :  { %404 = vmatprep.subr.bf16.mxu1 %v535_v0  ;;  %v390_v27 = vpack.c.bf16 %v74_v23, %v73_v22  ;;  %v76_v29 = vld [vmem:[#allocation6 + $0x58] sm:$0xff]  ;;  %v411_v30 = vpack.c.bf16 %v168_v26, %v167_v25  ;;  %v169_v31 = vld [vmem:[#allocation8 + $0x40] sm:$0xff]  ;;  %v170_v32 = vld [vmem:[#allocation8 + $0x48] sm:$0xff] }
  0x3e   :  { %382 = vmatpush3.bf16.msra.mxu0 %v381_v7  ;;  %v393_v33 = vpack.c.bf16 %v76_v29, %v75_v28  ;;  %v77_v34 = vld [vmem:[#allocation6 + $0x60] sm:$0xff]  ;;  %v78_v35 = vld [vmem:[#allocation6 + $0x68] sm:$0xff]  ;;  %v414_v36 = vpack.c.bf16 %v170_v32, %v169_v31  ;;  %v79_v38 = vld [vmem:[#allocation6 + $0x70] sm:$0xff]  ;;  %p510_p0 = pnand %p509_p13, %p503_p10 }
  0x3f   :  { %383 = vmatprep.subr.bf16.mxu0 %v535_v0  ;;  %v396_v37 = vpack.c.bf16 %v78_v35, %v77_v34  ;;  %v80_v39 = vld [vmem:[#allocation6 + $0x78] sm:$0xff]  ;;  %v171_v42 = vld [vmem:[#allocation8 + $0x50] sm:$0xff]  ;;  %v173_v45 = vld [vmem:[#allocation8 + $0x60] sm:$0xff] }
  0x40   :  { %406 = vmatpush3.bf16.msra.mxu1 %v405_v18  ;;  %v399_v40 = vpack.c.bf16 %v80_v39, %v79_v38  ;;  %v64_v41 = vld [vmem:[#allocation3] sm:$0xff]  ;;  %v174_v46 = vld [vmem:[#allocation8 + $0x68] sm:$0xff]  ;;  %v175_v48 = vld [vmem:[#allocation8 + $0x70] sm:$0xff] }
  0x41   :  { %407 = vmatprep.subr.bf16.mxu1 %v535_v0  ;;  %v172_v43 = vld [vmem:[#allocation8 + $0x58] sm:$0xff]  ;;  %v420_v47 = vpack.c.bf16 %v174_v46, %v173_v45 }
  0x42   :  { %385 = vmatpush3.bf16.msra.mxu0 %v384_v14  ;;  %v417_v44 = vpack.c.bf16 %v172_v43, %v171_v42  ;;  %v176_v49 = vld [vmem:[#allocation8 + $0x78] sm:$0xff] }
  0x43   :  { %386 = vmatprep.subr.bf16.mxu0 %v535_v0  ;;  %v423_v50 = vpack.c.bf16 %v176_v49, %v175_v48  ;;  %v271_v51 = vld [vmem:[%s647_s2] ss:$0 sm:$0xff] }
  0x44   :  { %409 = vmatpush3.bf16.msra.mxu1 %v408_v24  ;;  %v272_v56 = vld [vmem:[%s649_s4] ss:$0 sm:$0xff] }
  0x45   :  { %410 = vmatprep.subr.bf16.mxu1 %v535_v0 }
  0x46   :  { %388 = vmatpush3.bf16.msra.mxu0 %v387_v21 }
  0x47   :  { %389 = vmatprep.subr.bf16.mxu0 %v535_v0 }
  0x48   :  { %412 = vmatpush3.bf16.msra.mxu1 %v411_v30 }
  0x49   :  { %413 = vmatprep.subr.bf16.mxu1 %v535_v0 }
  0x4a   :  { %391 = vmatpush3.bf16.msra.mxu0 %v390_v27 }
  0x4b   :  { %392 = vmatprep.subr.bf16.mxu0 %v535_v0 }
  0x4c   :  { %415 = vmatpush3.bf16.msra.mxu1 %v414_v36 }
  0x4d   :  { %416 = vmatprep.subr.bf16.mxu1 %v535_v0 }
  0x4e   :  { %394 = vmatpush3.bf16.msra.mxu0 %v393_v33 }
  0x4f   :  { %395 = vmatprep.subr.bf16.mxu0 %v535_v0 }
  0x50   :  { %418 = vmatpush3.bf16.msra.mxu1 %v417_v44 }
  0x51   :  { %419 = vmatprep.subr.bf16.mxu1 %v535_v0 }
  0x52   :  { %397 = vmatpush3.bf16.msra.mxu0 %v396_v37 }
  0x53   :  { %398 = vmatprep.subr.bf16.mxu0 %v535_v0 }
  0x54   :  { %421 = vmatpush3.bf16.msra.mxu1 %v420_v47 }
  0x55   :  { %422 = vmatprep.subr.bf16.mxu1 %v535_v0 }
  0x56   :  { %400 = vmatpush3.bf16.msra.mxu0 %v399_v40 }
  0x58   :  { %424 = vmatpush3.bf16.msra.mxu1 %v423_v50 }
  0x59   :  { %340 = vmatmul.mubr.f32.vlgmr.msra.gmra.mrb[0].mxu0 %v64_v41 }
 0x12c   :  { %v154_v52 = vpop.f32.mrb[0].mxu0 }
 0x12d   :  { %v155_v53 = vadd.f32 %v271_v51, %v154_v52  ;;  %v341_v54 = vpop.f32.mrb[1].mxu0 }
 0x12f   :  { %434 = vtanh.f32 %v155_v53 }
 0x139   :  { %v435_v55 = vpop.eup %434 }
 0x13a   :  { %375 = vmatmul.mubr.f32.vlgmr.msra.gmra.mrb[0].mxu1 %v435_v55 }
 0x20d   :  { %v250_v57 = vpop.f32.mrb[0].mxu1 }
 0x20e   :  { %v251_v58 = vadd.f32 %v272_v56, %v250_v57  ;;  %v376_v59 = vpop.f32.mrb[1].mxu1 }
 0x210   :  { %254 = vst [vmem:[#allocation9] sm:$0xff] %v251_v58 }
 0x211   :  { %513 = shalt.err (!%p510_p0)
}
 0x212   :  { %s514_s11 = scalar_lea.hbm %s650_s5, 128 }
 0x213   :  { %p515_p1 = scmp.ne.s32.totalorder %s650_s5, %s514_s11  ;;  %p518_p2 = scmp.lt.u32.totalorder %s514_s11, %s650_s5 }
 0x215   :  { %p520_p3 = pnand %p518_p2, %p515_p1 }
 0x217   :  { %523 = shalt.err (!%p520_p3)
}
 0x218   :  { %264 = dma.vmem_to_hbm [thread:$0]  %s262_s8, 128, %s650_s5, [#allocation5]  }
 0x219   :  { %528 = dma.done.wait [#allocation5], 128  }
 0x21a   :  { %529 = vsyncadd [#allocation5], 4294967168 }
 0x21b   :  { %268 = vsyncpa [#allocation4], 1 }
 0x21c   :  { %269 = vsyncpa [#allocation7], 1 }
 0x21d   :  { %270 = vsyncpa [#allocation5], 1 }

// kernel: tpu_custom_call.1
= control target key start
LH: loop header
LB: loop body
LE: loop exit
PB: predicated region body
PF: predicated region fallthrough
CT: control target
= control target key end

     0   :  { %10 = vsyncpa [#allocation4], 0  ;;  %s645_s0 = inlined_call_operand.hbm [shape: f32[8,128], index: 0, kind: input, shape index: {}]   ;;  %s646_s1 = inlined_call_operand.hbm [shape: f32[128,128], index: 1, kind: input, shape index: {}]   ;;  %s647_s2 = inlined_call_operand.vmem [shape: f32[1,128], index: 2, kind: input, shape index: {}]   ;;  %s648_s3 = inlined_call_operand.hbm [shape: f32[128,128], index: 3, kind: input, shape index: {}]   ;;  %s649_s4 = inlined_call_operand.vmem [shape: f32[1,128], index: 4, kind: input, shape index: {}]   ;;  %s650_s5 = inlined_call_operand.hbm [shape: f32[8,128], index: 5, kind: output, shape index: {}]  }
   0x1   :  { %11 = vsyncpa [#allocation7], 0 }
   0x2   :  { %12 = vsyncpa [#allocation5], 0  ;;  %s530_s18 = smov [#allocation6]   ;;  %s436_s22 = scalar_lea.hbm %s646_s1, 2048 }
   0x3   :  { %s28_s19 = sshll.u32 %s530_s18, 4  ;;  %p437_p0 = scmp.ne.s32.totalorder %s646_s1, %s436_s22  ;;  %s29_s19 = int_to_ptr.vmem [resolvable:$true] %s28_s19 }
   0x4   :  { %p440_p1 = scmp.lt.u32.totalorder %s436_s22, %s646_s1 }
   0x6   :  { %p442_p2 = pnand %p440_p1, %p437_p0 }
   0x8   :  { %445 = shalt.err (!%p442_p2)
}
   0x9   :  { %s446_s27 = scalar_lea.vmem %s29_s19, 2048  ;;  %p451_p4 = scmp.lt.s32.totalorder %s29_s19, %s29_s19 }
   0xa   :  { %p447_p3 = scmp.ne.s32.totalorder %s29_s19, %s446_s27  ;;  %p452_p5 = scmp.lt.s32.totalorder %s446_s27, %s446_s27 }
   0xc   :  { %p453_p6 = por %p452_p5, %p451_p4 }
   0xe   :  { %p454_p7 = pnand %p453_p6, %p447_p3 }
  0x10   :  { %457 = shalt.err (!%p454_p7)
}
  0x11   :  { %s531_s28 = smov 128   ;;  %s532_s29 = smov 8  }
  0x12   :  { %34 = dma.hbm_to_vmem [thread:$0]  %s646_s1, 2048, %s29_s19, [#allocation7], %s531_s28, %s531_s28, %s532_s29  }
  0x13   :  { %s533_s7 = smov [#allocation3]   ;;  %s534_s9 = smov [#allocation8]  }
  0x14   :  { %s19_s8 = sshll.u32 %s533_s7, 4  ;;  %s42_s10 = sshll.u32 %s534_s9, 4  ;;  %s20_s8 = int_to_ptr.vmem [resolvable:$true] %s19_s8  ;;  %s43_s10 = int_to_ptr.vmem [resolvable:$true] %s42_s10 }
  0x15   :  { %s458_s13 = scalar_lea.hbm %s645_s0, 128 }
  0x16   :  { %p459_p8 = scmp.ne.s32.totalorder %s645_s0, %s458_s13  ;;  %p462_p9 = scmp.lt.u32.totalorder %s458_s13, %s645_s0 }
  0x18   :  { %p464_p10 = pnand %p462_p9, %p459_p8 }
  0x1a   :  { %467 = shalt.err (!%p464_p10)
}
  0x1b   :  { %s468_s1 = scalar_lea.vmem %s20_s8, 128  ;;  %p473_p12 = scmp.lt.s32.totalorder %s20_s8, %s20_s8 }
  0x1c   :  { %p469_p11 = scmp.ne.s32.totalorder %s20_s8, %s468_s1  ;;  %p474_p13 = scmp.lt.s32.totalorder %s468_s1, %s468_s1 }
  0x1e   :  { %p475_p0 = por %p474_p13, %p473_p12 }
  0x20   :  { %p476_p1 = pnand %p475_p0, %p469_p11 }
  0x22   :  { %479 = shalt.err (!%p476_p1)
}
  0x23   :  { %22 = dma.hbm_to_vmem [thread:$0]  %s645_s0, 128, %s20_s8, [#allocation4]  }
  0x24   :  { %s480_s22 = scalar_lea.hbm %s648_s3, 2048 }
  0x25   :  { %p481_p2 = scmp.ne.s32.totalorder %s648_s3, %s480_s22  ;;  %p484_p3 = scmp.lt.u32.totalorder %s480_s22, %s648_s3 }
  0x27   :  { %p486_p4 = pnand %p484_p3, %p481_p2 }
  0x29   :  { %489 = shalt.err (!%p486_p4)
}
  0x2a   :  { %s490_s27 = scalar_lea.vmem %s43_s10, 2048  ;;  %p495_p6 = scmp.lt.s32.totalorder %s43_s10, %s43_s10 }
  0x2b   :  { %p491_p5 = scmp.ne.s32.totalorder %s43_s10, %s490_s27  ;;  %p496_p7 = scmp.lt.s32.totalorder %s490_s27, %s490_s27 }
  0x2d   :  { %p497_p8 = por %p496_p7, %p495_p6 }
  0x2f   :  { %p498_p9 = pnand %p497_p8, %p491_p5 }
  0x31   :  { %501 = shalt.err (!%p498_p9)
}
  0x32   :  { %48 = dma.hbm_to_vmem [thread:$0]  %s648_s3, 2048, %s43_s10, [#allocation7], %s531_s28, %s531_s28, %s532_s29  }
  0x33   :  { %524 = dma.done.wait [#allocation4], 128  }
  0x34   :  { %525 = vsyncadd [#allocation4], 4294967168 }
  0x35   :  { %526 = dma.done.wait [#allocation7], 4096  }
  0x36   :  { %527 = vsyncadd [#allocation7], 4294963200  ;;  %v535_v0 = vmov 0.0|0.0   ;;  %vm536_vm0 = vmmov 0   ;;  %v537_v1 = vmov 0.0   ;;  %v65_v2 = vld [vmem:[#allocation6] sm:$0xff] }
  0x37   :  { %377 = vmatprep.subr.bf16.mxu0 %v535_v0  ;;  %339 = vmatprep.mubr.msk.f32.mxu0 %vm536_vm0, %v537_v1  ;;  %v66_v3 = vld [vmem:[#allocation6 + $0x8] sm:$0xff]  ;;  %v67_v4 = vld [vmem:[#allocation6 + $0x10] sm:$0xff]  ;;  %v68_v6 = vld [vmem:[#allocation6 + $0x18] sm:$0xff]  ;;  %s538_s7 = smov [#allocation9]  }
  0x38   :  { %401 = vmatprep.subr.bf16.mxu1 %v535_v0  ;;  %374 = vmatprep.mubr.msk.f32.mxu1 %vm536_vm0, %v537_v1  ;;  %v378_v5 = vpack.c.bf16 %v66_v3, %v65_v2  ;;  %v381_v7 = vpack.c.bf16 %v68_v6, %v67_v4  ;;  %v69_v8 = vld [vmem:[#allocation6 + $0x20] sm:$0xff]  ;;  %v70_v9 = vld [vmem:[#allocation6 + $0x28] sm:$0xff]  ;;  %v163_v12 = vld [vmem:[#allocation8 + $0x10] sm:$0xff]  ;;  %s261_s8 = sshll.u32 %s538_s7, 4  ;;  %s262_s8 = int_to_ptr.vmem [resolvable:$true] %s261_s8 }
  0x39   :  { %v161_v10 = vld [vmem:[#allocation8] sm:$0xff]  ;;  %v162_v11 = vld [vmem:[#allocation8 + $0x8] sm:$0xff]  ;;  %v164_v13 = vld [vmem:[#allocation8 + $0x18] sm:$0xff]  ;;  %v384_v14 = vpack.c.bf16 %v70_v9, %v69_v8  ;;  %s502_s9 = scalar_lea.vmem %s262_s8, 128  ;;  %p507_p11 = scmp.lt.s32.totalorder %s262_s8, %s262_s8 }
  0x3a   :  { %379 = vmatpush3.bf16.msra.mxu0 %v378_v5  ;;  %v402_v15 = vpack.c.bf16 %v162_v11, %v161_v10  ;;  %v71_v16 = vld [vmem:[#allocation6 + $0x30] sm:$0xff]  ;;  %v72_v17 = vld [vmem:[#allocation6 + $0x38] sm:$0xff]  ;;  %v405_v18 = vpack.c.bf16 %v164_v13, %v163_v12  ;;  %v165_v19 = vld [vmem:[#allocation8 + $0x20] sm:$0xff]  ;;  %p503_p10 = scmp.ne.s32.totalorder %s262_s8, %s502_s9  ;;  %p508_p12 = scmp.lt.s32.totalorder %s502_s9, %s502_s9 }
  0x3b   :  { %380 = vmatprep.subr.bf16.mxu0 %v535_v0  ;;  %v166_v20 = vld [vmem:[#allocation8 + $0x28] sm:$0xff]  ;;  %v387_v21 = vpack.c.bf16 %v72_v17, %v71_v16  ;;  %v73_v22 = vld [vmem:[#allocation6 + $0x40] sm:$0xff]  ;;  %v167_v25 = vld [vmem:[#allocation8 + $0x30] sm:$0xff] }
  0x3c   :  { %403 = vmatpush3.bf16.msra.mxu1 %v402_v15  ;;  %v74_v23 = vld [vmem:[#allocation6 + $0x48] sm:$0xff]  ;;  %v408_v24 = vpack.c.bf16 %v166_v20, %v165_v19  ;;  %v168_v26 = vld [vmem:[#allocation8 + $0x38] sm:$0xff]  ;;  %v75_v28 = vld [vmem:[#allocation6 + $0x50] sm:$0xff]  ;;  %p509_p13 = por %p508_p12, %p507_p11 }
  0x3d   :  { %404 = vmatprep.subr.bf16.mxu1 %v535_v0  ;;  %v390_v27 = vpack.c.bf16 %v74_v23, %v73_v22  ;;  %v76_v29 = vld [vmem:[#allocation6 + $0x58] sm:$0xff]  ;;  %v411_v30 = vpack.c.bf16 %v168_v26, %v167_v25  ;;  %v169_v31 = vld [vmem:[#allocation8 + $0x40] sm:$0xff]  ;;  %v170_v32 = vld [vmem:[#allocation8 + $0x48] sm:$0xff] }
  0x3e   :  { %382 = vmatpush3.bf16.msra.mxu0 %v381_v7  ;;  %v393_v33 = vpack.c.bf16 %v76_v29, %v75_v28  ;;  %v77_v34 = vld [vmem:[#allocation6 + $0x60] sm:$0xff]  ;;  %v78_v35 = vld [vmem:[#allocation6 + $0x68] sm:$0xff]  ;;  %v414_v36 = vpack.c.bf16 %v170_v32, %v169_v31  ;;  %v79_v38 = vld [vmem:[#allocation6 + $0x70] sm:$0xff]  ;;  %p510_p0 = pnand %p509_p13, %p503_p10 }
  0x3f   :  { %383 = vmatprep.subr.bf16.mxu0 %v535_v0  ;;  %v396_v37 = vpack.c.bf16 %v78_v35, %v77_v34  ;;  %v80_v39 = vld [vmem:[#allocation6 + $0x78] sm:$0xff]  ;;  %v171_v42 = vld [vmem:[#allocation8 + $0x50] sm:$0xff]  ;;  %v173_v45 = vld [vmem:[#allocation8 + $0x60] sm:$0xff] }
  0x40   :  { %406 = vmatpush3.bf16.msra.mxu1 %v405_v18  ;;  %v399_v40 = vpack.c.bf16 %v80_v39, %v79_v38  ;;  %v64_v41 = vld [vmem:[#allocation3] sm:$0xff]  ;;  %v174_v46 = vld [vmem:[#allocation8 + $0x68] sm:$0xff]  ;;  %v175_v48 = vld [vmem:[#allocation8 + $0x70] sm:$0xff] }
  0x41   :  { %407 = vmatprep.subr.bf16.mxu1 %v535_v0  ;;  %v172_v43 = vld [vmem:[#allocation8 + $0x58] sm:$0xff]  ;;  %v420_v47 = vpack.c.bf16 %v174_v46, %v173_v45 }
  0x42   :  { %385 = vmatpush3.bf16.msra.mxu0 %v384_v14  ;;  %v417_v44 = vpack.c.bf16 %v172_v43, %v171_v42  ;;  %v176_v49 = vld [vmem:[#allocation8 + $0x78] sm:$0xff] }
  0x43   :  { %386 = vmatprep.subr.bf16.mxu0 %v535_v0  ;;  %v423_v50 = vpack.c.bf16 %v176_v49, %v175_v48  ;;  %v271_v51 = vld [vmem:[%s647_s2] ss:$0 sm:$0xff] }
  0x44   :  { %409 = vmatpush3.bf16.msra.mxu1 %v408_v24  ;;  %v272_v56 = vld [vmem:[%s649_s4] ss:$0 sm:$0xff] }
  0x45   :  { %410 = vmatprep.subr.bf16.mxu1 %v535_v0 }
  0x46   :  { %388 = vmatpush3.bf16.msra.mxu0 %v387_v21 }
  0x47   :  { %389 = vmatprep.subr.bf16.mxu0 %v535_v0 }
  0x48   :  { %412 = vmatpush3.bf16.msra.mxu1 %v411_v30 }
  0x49   :  { %413 = vmatprep.subr.bf16.mxu1 %v535_v0 }
  0x4a   :  { %391 = vmatpush3.bf16.msra.mxu0 %v390_v27 }
  0x4b   :  { %392 = vmatprep.subr.bf16.mxu0 %v535_v0 }
  0x4c   :  { %415 = vmatpush3.bf16.msra.mxu1 %v414_v36 }
  0x4d   :  { %416 = vmatprep.subr.bf16.mxu1 %v535_v0 }
  0x4e   :  { %394 = vmatpush3.bf16.msra.mxu0 %v393_v33 }
  0x4f   :  { %395 = vmatprep.subr.bf16.mxu0 %v535_v0 }
  0x50   :  { %418 = vmatpush3.bf16.msra.mxu1 %v417_v44 }
  0x51   :  { %419 = vmatprep.subr.bf16.mxu1 %v535_v0 }
  0x52   :  { %397 = vmatpush3.bf16.msra.mxu0 %v396_v37 }
  0x53   :  { %398 = vmatprep.subr.bf16.mxu0 %v535_v0 }
  0x54   :  { %421 = vmatpush3.bf16.msra.mxu1 %v420_v47 }
  0x55   :  { %422 = vmatprep.subr.bf16.mxu1 %v535_v0 }
  0x56   :  { %400 = vmatpush3.bf16.msra.mxu0 %v399_v40 }
  0x58   :  { %424 = vmatpush3.bf16.msra.mxu1 %v423_v50 }
  0x59   :  { %340 = vmatmul.mubr.f32.vlgmr.msra.gmra.mrb[0].mxu0 %v64_v41 }
 0x12c   :  { %v154_v52 = vpop.f32.mrb[0].mxu0 }
 0x12d   :  { %v155_v53 = vadd.f32 %v271_v51, %v154_v52  ;;  %v341_v54 = vpop.f32.mrb[1].mxu0 }
 0x12f   :  { %434 = vtanh.f32 %v155_v53 }
 0x139   :  { %v435_v55 = vpop.eup %434 }
 0x13a   :  { %375 = vmatmul.mubr.f32.vlgmr.msra.gmra.mrb[0].mxu1 %v435_v55 }
 0x20d   :  { %v250_v57 = vpop.f32.mrb[0].mxu1 }
 0x20e   :  { %v251_v58 = vadd.f32 %v272_v56, %v250_v57  ;;  %v376_v59 = vpop.f32.mrb[1].mxu1 }
 0x210   :  { %254 = vst [vmem:[#allocation9] sm:$0xff] %v251_v58 }
 0x211   :  { %513 = shalt.err (!%p510_p0)
}
 0x212   :  { %s514_s11 = scalar_lea.hbm %s650_s5, 128 }
 0x213   :  { %p515_p1 = scmp.ne.s32.totalorder %s650_s5, %s514_s11  ;;  %p518_p2 = scmp.lt.u32.totalorder %s514_s11, %s650_s5 }
 0x215   :  { %p520_p3 = pnand %p518_p2, %p515_p1 }
 0x217   :  { %523 = shalt.err (!%p520_p3)
}
 0x218   :  { %264 = dma.vmem_to_hbm [thread:$0]  %s262_s8, 128, %s650_s5, [#allocation5]  }
 0x219   :  { %528 = dma.done.wait [#allocation5], 128  }
 0x21a   :  { %529 = vsyncadd [#allocation5], 4294967168 }
 0x21b   :  { %268 = vsyncpa [#allocation4], 1 }
 0x21c   :  { %269 = vsyncpa [#allocation7], 1 }
 0x21d   :  { %270 = vsyncpa [#allocation5], 1 }

</bundles_post_ra>
